<compile_context>
chip_gen: v7x
topology: tpu7x:2x2x1
jax: 0.10.0
libtpu: 0.0.40
codegen_flags: <defaults>
</compile_context>

<pallas_src>
import jax
import jax.numpy as jnp
from jax import lax
from jax.experimental import pallas as pl
from jax.experimental.pallas import tpu as pltpu

EPS = 1e-5  # nn.BatchNorm1d default eps


def _round_up(v, m):
    return -(-v // m) * m


def _physical_vmem_bytes():
    """Per-core physical VMEM, generation-aware, with a conservative fallback."""
    try:
        info = pltpu.get_tpu_info()
        vb = getattr(info, "vmem_capacity_bytes", None)
        if vb:
            return int(vb)
    except Exception:
        pass
    return 64 * 2**20  # v7x per-TC physical; safe lower bound for v5e/v6e (128 MiB)


def _bn_relu_max(z3, gamma, beta, inv_count, act_dtype):
    """Train-mode BN (folded scale/shift) -> ReLU -> max over L.

    z3: (N, L, C) f32; gamma/beta: (C,) f32.
    Returns y2 (N*L, C) in act_dtype (2D, ready for the next MXU matmul) and
    mx (N, C) = max_L(y).

    Both reductions are taken from the same in-register z3 value (one sweep of
    z, no second VMEM read).  Variance uses the one-pass E[z^2]-E[z]^2 form:
    all statistics are f32 and BN-normalised activations keep |mean|/std ~O(1),
    far from the cancellation regime; switch to a two-pass/Welford form only
    if that ever changes.
    """
    s = jnp.sum(z3, axis=(0, 1), keepdims=True)            # (1, 1, C)
    ss = jnp.sum(z3 * z3, axis=(0, 1), keepdims=True)      # (1, 1, C)
    mean = s * inv_count
    var = jnp.maximum(ss * inv_count - mean * mean, 0.0)    # biased batch var
    scale = gamma[None, None, :] * lax.rsqrt(var + EPS)     # (1, 1, C)
    shift = beta[None, None, :] - mean * scale
    y = jnp.maximum(z3 * scale + shift, 0.0).astype(act_dtype)
    n, l, c = z3.shape
    return y.reshape(n * l, c), jnp.max(y, axis=1)           # (N*L, C), (N, C)


def _make_kernel(depth, n, l, width, matmul_dtype, act_dtype):
    """Fused kernel: all layers + final pool; activations stay in VMEM."""
    nl = n * l
    inv_count = 1.0 / float(nl)

    def kernel(x_ref, w0_ref, wt_ref, wb_ref, g_ref, b_ref, o_ref):
        # ---- layer 0: contract the tiny 4-channel axis of the channel-major
        # input directly: (4, N*L)^T (4, width) -> (N*L, width).  Keeps the
        # input DMA lane-dense; K=4 is negligible, so this stays f32.
        z = lax.dot_general(
            x_ref[...], w0_ref[...],
            dimension_numbers=(((0,), (0,)), ((), ())),
            preferred_element_type=jnp.float32)              # (N*L, width)
        y, mx = _bn_relu_max(z.reshape(n, l, width),
                             g_ref[0], b_ref[0], inv_count, act_dtype)

        # ---- layers 1..depth-1: explicit 2D MXU matmul on N*L rows; the
        # concat/repeat half is computed on N rows only and broadcast along L.
        for i in range(1, depth):
            wt = wt_ref[i - 1]                                # (width, width)
            wb = wb_ref[i - 1]                                # pre-cast dtype
            z = jnp.dot(y.astype(matmul_dtype), wt,
                        preferred_element_type=jnp.float32)   # (N*L, width)
            z_mx = jnp.dot(mx.astype(matmul_dtype), wb,
                           preferred_element_type=jnp.float32)  # (N, width)
            z3 = z.reshape(n, l, width) + z_mx[:, None, :]      # (N, L, width)
            y, mx = _bn_relu_max(z3, g_ref[i], b_ref[i], inv_count, act_dtype)

        # ---- final pool: max_L(concat(y, repeat(mx))) == [mx, mx]
        o_ref[...] = jnp.concatenate([mx, mx], axis=-1).astype(o_ref.dtype)

    return kernel


def polyline_encoder_forward(x_ncl, params,
                             matmul_dtype=jnp.bfloat16, act_dtype=None):
    """x_ncl: (N, 4, L) PyTorch NCL input -> (N, 2*width) node features.

    matmul_dtype: MXU input dtype for the width x width matmuls (f32
      accumulation either way).  bf16 default: ~3x MXU throughput vs emulated
      f32 on v5e/v6e/v7x and half the weight DMA/VMEM.  Pass jnp.float32 for
      bit-level fidelity with the reference.
    act_dtype: storage dtype of inter-layer activations (BN statistics and the
      normalise/ReLU math are always f32).  Defaults to matmul_dtype; pass
      jnp.float32 on v5e (no native bf16 VPU) or for tighter numerics.
    """
    if act_dtype is None:
        act_dtype = matmul_dtype

    gamma = params["gamma"].astype(jnp.float32)       # (depth, width)
    beta = params["beta"].astype(jnp.float32)
    depth, width = gamma.shape
    n, cin, l = x_ncl.shape
    assert cin == 4

    w0 = params["w0"].astype(jnp.float32)             # layer 0 (K=4) stays f32
    w_top = params["w_top"].astype(matmul_dtype)      # pre-cast in the wrapper:
    w_bot = params["w_bot"].astype(matmul_dtype)      # half DMA, no in-kernel casts

    # Channel-major, lane-dense input (4, N*L).  The old (N, L, 4) layout put
    # the 4-wide channel dim on lanes (padded 4 -> 128, ~32x the input bytes).
    # Callers that already hold channel-major data can skip this cheap
    # XLA-side transpose entirely.
    x_cm = jnp.transpose(x_ncl, (1, 0, 2)).reshape(cin, n * l).astype(jnp.float32)

    # --- VMEM budget (generation-aware).  The fused kernel keeps the full
    # batch resident because exact train-mode BN couples the whole batch.
    itm = jnp.dtype(matmul_dtype).itemsize
    ita = jnp.dtype(act_dtype).itemsize
    nl = n * l
    est_bytes = int(
        8 * _round_up(nl, 128) * 4                          # (4->8, N*L) input
        + 8 * width * 4                                     # w0
        + 2 * max(depth - 1, 1) * width * width * itm       # w_top / w_bot
        + 2 * _round_up(depth, 8) * width * 4               # gamma / beta
        + _round_up(nl, 8) * width * (3 * 4 + 2 * ita)      # z/z3/temps (f32) + y
        + 6 * _round_up(n, 8) * width * 4)                  # mx, z_mx, output
    phys_vmem = _physical_vmem_bytes()   # 128 MiB v5e/v6e, 64 MiB per-TC v7x
    assert est_bytes < int(0.7 * phys_vmem), (
        "batch too large for the fused VMEM-resident kernel "
        f"(~{est_bytes >> 20} MiB of ~{phys_vmem >> 20} MiB VMEM); "
        "use the two-pass N-tiled variant (see TODO at top of file)")
    vmem_limit = int(min(int(0.85 * phys_vmem),
                         max(8 * 2**20, 2 * est_bytes)))

    vmem = pl.BlockSpec(memory_space=pltpu.MemorySpace.VMEM)
    return pl.pallas_call(
        _make_kernel(depth, n, l, width, matmul_dtype, act_dtype),
        out_shape=jax.ShapeDtypeStruct((n, 2 * width), jnp.float32),
        in_specs=[vmem] * 6,
        out_specs=vmem,
        compiler_params=pltpu.CompilerParams(vmem_limit_bytes=vmem_limit),
    )(x_cm, w0, w_top, w_bot, gamma, beta)


def init_params(key, depth, width):
    """Deterministic synthetic parameters (PyTorch-like init ranges).

    The Linear bias is intentionally omitted: under train-mode BatchNorm the
    mean subtraction cancels a per-channel additive bias exactly.
    """
    n_rest = max(depth - 1, 1)
    key, k0, kg, kb = jax.random.split(key, 4)
    b0 = 1.0 / (4 ** 0.5)
    w0 = jax.random.uniform(k0, (4, width), jnp.float32, -b0, b0)
    gamma = jax.random.uniform(kg, (depth, width), jnp.float32, 0.9, 1.1)
    beta = jax.random.uniform(kb, (depth, width), jnp.float32, -0.1, 0.1)
    w_top = jnp.zeros((n_rest, width, width), jnp.float32)
    w_bot = jnp.zeros((n_rest, width, width), jnp.float32)
    for i in range(1, depth):
        key, k1, k2 = jax.random.split(key, 3)
        bound = 1.0 / ((2 * width) ** 0.5)
        w_top = w_top.at[i - 1].set(
            jax.random.uniform(k1, (width, width), jnp.float32, -bound, bound))
        w_bot = w_bot.at[i - 1].set(
            jax.random.uniform(k2, (width, width), jnp.float32, -bound, bound))
    return dict(w0=w0, w_top=w_top, w_bot=w_bot, gamma=gamma, beta=beta)


def _reference_forward(x_ncl, params):
    """Pure-jnp replica of the PyTorch module (naive concat/repeat path)."""
    w0, w_top, w_bot = params["w0"], params["w_top"], params["w_bot"]
    gamma, beta = params["gamma"], params["beta"]
    depth = gamma.shape[0]
    x = jnp.transpose(x_ncl, (0, 2, 1)).astype(jnp.float32)   # (N, L, 4)
    for i in range(depth):
        if i == 0:
            w = w0                                            # (4, width)
        else:
            w = jnp.concatenate([w_top[i - 1], w_bot[i - 1]], axis=0)
        z = jnp.einsum("nlc,cd->nld", x, w)
        mean = jnp.mean(z, axis=(0, 1), keepdims=True)
        var = jnp.mean(jnp.square(z - mean), axis=(0, 1), keepdims=True)
        y = ((z - mean) * lax.rsqrt(var + EPS)
             * gamma[i][None, None, :] + beta[i][None, None, :])
        y = jnp.maximum(y, 0.0)
        mx = jnp.max(y, axis=1, keepdims=True)
        x = jnp.concatenate([y, jnp.broadcast_to(mx, y.shape)], axis=-1)
    return jnp.max(x, axis=1)                                  # (N, 2*width)


if __name__ == "__main__":
    depth, width = 3, 128     # width=128: full-lane activations / matmul K,
    N, L = 4, 16              # 2*width = 256 -> lane-dense final store

    key = jax.random.PRNGKey(0)
    kx, kp = jax.random.split(key)
    x = jax.random.normal(kx, (N, 4, L), jnp.float32)          # PyTorch NCL input
    params = init_params(kp, depth, width)

    ref = jax.block_until_ready(_reference_forward(x, params))

    # f32 matmul/activation path: tight fidelity with the reference.
    fwd_f32 = jax.jit(lambda inp: polyline_encoder_forward(
        inp, params, matmul_dtype=jnp.float32, act_dtype=jnp.float32))
    out_f32 = jax.block_until_ready(fwd_f32(x))
    assert out_f32.shape == (N, 2 * width), out_f32.shape
    assert out_f32.dtype == jnp.float32
    assert jnp.allclose(out_f32, ref, rtol=1e-3, atol=1e-3), (
        float(jnp.max(jnp.abs(out_f32 - ref))))

    # Default bf16 matmul/activation path (v6e/v7x fast path; f32 accumulate +
    # f32 BN math).  bf16 rounding compounds across depth layers, so validate
    # at a bf16-appropriate tolerance; the f32 path above keeps the 1e-3 check.
    fwd_bf16 = jax.jit(lambda inp: polyline_encoder_forward(inp, params))
    out_bf16 = jax.block_until_ready(fwd_bf16(x))
    assert out_bf16.shape == (N, 2 * width), out_bf16.shape
    assert out_bf16.dtype == jnp.float32
    assert jnp.allclose(out_bf16, ref, rtol=5e-2, atol=5e-2), (
        float(jnp.max(jnp.abs(out_bf16 - ref))))

    print("KERNEL_OK")
</pallas_src>

<mosaic_0001>
module attributes {stable_mosaic.version = 11 : i64} {
  func.func @kernel(%arg0: memref<4x64xf32, #tpu.memory_space<vmem>>, %arg1: memref<4x128xf32, #tpu.memory_space<vmem>>, %arg2: memref<2x128x128xf32, #tpu.memory_space<vmem>>, %arg3: memref<2x128x128xf32, #tpu.memory_space<vmem>>, %arg4: memref<3x128xf32, #tpu.memory_space<vmem>>, %arg5: memref<3x128xf32, #tpu.memory_space<vmem>>, %arg6: memref<4x256xf32, #tpu.memory_space<vmem>>) attributes {dimension_semantics = [], scalar_prefetch = 0 : i64, scratch_operands = 0 : i64, tpu.core_type = #tpu.core_type<tc>} {
    %c0 = arith.constant 0 : index
    %c0_0 = arith.constant 0 : index
    %0 = vector.load %arg0[%c0, %c0_0] : memref<4x64xf32, #tpu.memory_space<vmem>>, vector<4x64xf32>
    %c0_1 = arith.constant 0 : index
    %c0_2 = arith.constant 0 : index
    %1 = vector.load %arg1[%c0_1, %c0_2] : memref<4x128xf32, #tpu.memory_space<vmem>>, vector<4x128xf32>
    %cst = arith.constant dense<0.000000e+00> : vector<64x128xf32>
    %2 = tpu.matmul %0, %1, %cst {dimension_numbers = #tpu.dot_dimension_numbers<[0], [0], [1], [1], [0, 1, 1, 1], [], []>} : vector<4x64xf32>, vector<4x128xf32>, vector<64x128xf32> -> vector<64x128xf32>
    %3 = vector.shape_cast %2 : vector<64x128xf32> to vector<4x16x128xf32>
    %c0_3 = arith.constant 0 : index
    %c0_4 = arith.constant 0 : index
    %4 = vector.load %arg4[%c0_3, %c0_4] : memref<3x128xf32, #tpu.memory_space<vmem>>, vector<1x128xf32>
    %5 = vector.shape_cast %4 : vector<1x128xf32> to vector<128xf32>
    %c0_5 = arith.constant 0 : index
    %c0_6 = arith.constant 0 : index
    %6 = vector.load %arg5[%c0_5, %c0_6] : memref<3x128xf32, #tpu.memory_space<vmem>>, vector<1x128xf32>
    %7 = vector.shape_cast %6 : vector<1x128xf32> to vector<128xf32>
    %cst_7 = arith.constant dense<0.000000e+00> : vector<128xf32>
    %8 = vector.multi_reduction <add>, %3, %cst_7 [0, 1] : vector<4x16x128xf32> to vector<128xf32>
    %9 = vector.shape_cast %8 : vector<128xf32> to vector<1x1x128xf32>
    %10 = arith.mulf %3, %3 : vector<4x16x128xf32>
    %cst_8 = arith.constant dense<0.000000e+00> : vector<128xf32>
    %11 = vector.multi_reduction <add>, %10, %cst_8 [0, 1] : vector<4x16x128xf32> to vector<128xf32>
    %12 = vector.shape_cast %11 : vector<128xf32> to vector<1x1x128xf32>
    %cst_9 = arith.constant 1.562500e-02 : f32
    %13 = vector.broadcast %cst_9 : f32 to vector<1x1x128xf32>
    %14 = arith.mulf %9, %13 : vector<1x1x128xf32>
    %cst_10 = arith.constant 1.562500e-02 : f32
    %15 = vector.broadcast %cst_10 : f32 to vector<1x1x128xf32>
    %16 = arith.mulf %12, %15 : vector<1x1x128xf32>
    %17 = arith.mulf %14, %14 : vector<1x1x128xf32>
    %18 = arith.subf %16, %17 : vector<1x1x128xf32>
    %cst_11 = arith.constant 0.000000e+00 : f32
    %19 = vector.broadcast %cst_11 : f32 to vector<1x1x128xf32>
    %20 = arith.maximumf %18, %19 : vector<1x1x128xf32>
    %21 = vector.shape_cast %5 : vector<128xf32> to vector<1x1x128xf32>
    %cst_12 = arith.constant 9.99999974E-6 : f32
    %22 = vector.broadcast %cst_12 : f32 to vector<1x1x128xf32>
    %23 = arith.addf %20, %22 : vector<1x1x128xf32>
    %24 = math.rsqrt %23 : vector<1x1x128xf32>
    %25 = arith.mulf %21, %24 : vector<1x1x128xf32>
    %26 = vector.shape_cast %7 : vector<128xf32> to vector<1x1x128xf32>
    %27 = arith.mulf %14, %25 : vector<1x1x128xf32>
    %28 = arith.subf %26, %27 : vector<1x1x128xf32>
    %29 = vector.broadcast %25 : vector<1x1x128xf32> to vector<4x16x128xf32>
    %30 = arith.mulf %3, %29 : vector<4x16x128xf32>
    %31 = vector.broadcast %28 : vector<1x1x128xf32> to vector<4x16x128xf32>
    %32 = arith.addf %30, %31 : vector<4x16x128xf32>
    %cst_13 = arith.constant 0.000000e+00 : f32
    %33 = vector.broadcast %cst_13 : f32 to vector<4x16x128xf32>
    %34 = arith.maximumf %32, %33 : vector<4x16x128xf32>
    %35 = vector.shape_cast %34 : vector<4x16x128xf32> to vector<64x128xf32>
    %cst_14 = arith.constant dense<0xFF800000> : vector<4x128xf32>
    %36 = vector.multi_reduction <maximumf>, %34, %cst_14 [1] : vector<4x16x128xf32> to vector<4x128xf32>
    %c0_15 = arith.constant 0 : index
    %c0_16 = arith.constant 0 : index
    %c0_17 = arith.constant 0 : index
    %37 = vector.load %arg2[%c0_15, %c0_16, %c0_17] : memref<2x128x128xf32, #tpu.memory_space<vmem>>, vector<1x128x128xf32>
    %38 = vector.shape_cast %37 : vector<1x128x128xf32> to vector<128x128xf32>
    %c0_18 = arith.constant 0 : index
    %c0_19 = arith.constant 0 : index
    %c0_20 = arith.constant 0 : index
    %39 = vector.load %arg3[%c0_18, %c0_19, %c0_20] : memref<2x128x128xf32, #tpu.memory_space<vmem>>, vector<1x128x128xf32>
    %40 = vector.shape_cast %39 : vector<1x128x128xf32> to vector<128x128xf32>
    %cst_21 = arith.constant dense<0.000000e+00> : vector<64x128xf32>
    %41 = tpu.matmul %35, %38, %cst_21 {dimension_numbers = #tpu.dot_dimension_numbers<[1], [0], [0], [1], [0, 0, 1, 1], [], []>} : vector<64x128xf32>, vector<128x128xf32>, vector<64x128xf32> -> vector<64x128xf32>
    %cst_22 = arith.constant dense<0.000000e+00> : vector<4x128xf32>
    %42 = tpu.matmul %36, %40, %cst_22 {dimension_numbers = #tpu.dot_dimension_numbers<[1], [0], [0], [1], [0, 0, 1, 1], [], []>} : vector<4x128xf32>, vector<128x128xf32>, vector<4x128xf32> -> vector<4x128xf32>
    %43 = vector.shape_cast %41 : vector<64x128xf32> to vector<4x16x128xf32>
    %44 = vector.shape_cast %42 : vector<4x128xf32> to vector<4x1x128xf32>
    %45 = vector.broadcast %44 : vector<4x1x128xf32> to vector<4x16x128xf32>
    %46 = arith.addf %43, %45 : vector<4x16x128xf32>
    %c1 = arith.constant 1 : index
    %c0_23 = arith.constant 0 : index
    %47 = vector.load %arg4[%c1, %c0_23] : memref<3x128xf32, #tpu.memory_space<vmem>>, vector<1x128xf32>
    %48 = vector.shape_cast %47 : vector<1x128xf32> to vector<128xf32>
    %c1_24 = arith.constant 1 : index
    %c0_25 = arith.constant 0 : index
    %49 = vector.load %arg5[%c1_24, %c0_25] : memref<3x128xf32, #tpu.memory_space<vmem>>, vector<1x128xf32>
    %50 = vector.shape_cast %49 : vector<1x128xf32> to vector<128xf32>
    %cst_26 = arith.constant dense<0.000000e+00> : vector<128xf32>
    %51 = vector.multi_reduction <add>, %46, %cst_26 [0, 1] : vector<4x16x128xf32> to vector<128xf32>
    %52 = vector.shape_cast %51 : vector<128xf32> to vector<1x1x128xf32>
    %53 = arith.mulf %46, %46 : vector<4x16x128xf32>
    %cst_27 = arith.constant dense<0.000000e+00> : vector<128xf32>
    %54 = vector.multi_reduction <add>, %53, %cst_27 [0, 1] : vector<4x16x128xf32> to vector<128xf32>
    %55 = vector.shape_cast %54 : vector<128xf32> to vector<1x1x128xf32>
    %cst_28 = arith.constant 1.562500e-02 : f32
    %56 = vector.broadcast %cst_28 : f32 to vector<1x1x128xf32>
    %57 = arith.mulf %52, %56 : vector<1x1x128xf32>
    %cst_29 = arith.constant 1.562500e-02 : f32
    %58 = vector.broadcast %cst_29 : f32 to vector<1x1x128xf32>
    %59 = arith.mulf %55, %58 : vector<1x1x128xf32>
    %60 = arith.mulf %57, %57 : vector<1x1x128xf32>
    %61 = arith.subf %59, %60 : vector<1x1x128xf32>
    %cst_30 = arith.constant 0.000000e+00 : f32
    %62 = vector.broadcast %cst_30 : f32 to vector<1x1x128xf32>
    %63 = arith.maximumf %61, %62 : vector<1x1x128xf32>
    %64 = vector.shape_cast %48 : vector<128xf32> to vector<1x1x128xf32>
    %cst_31 = arith.constant 9.99999974E-6 : f32
    %65 = vector.broadcast %cst_31 : f32 to vector<1x1x128xf32>
    %66 = arith.addf %63, %65 : vector<1x1x128xf32>
    %67 = math.rsqrt %66 : vector<1x1x128xf32>
    %68 = arith.mulf %64, %67 : vector<1x1x128xf32>
    %69 = vector.shape_cast %50 : vector<128xf32> to vector<1x1x128xf32>
    %70 = arith.mulf %57, %68 : vector<1x1x128xf32>
    %71 = arith.subf %69, %70 : vector<1x1x128xf32>
    %72 = vector.broadcast %68 : vector<1x1x128xf32> to vector<4x16x128xf32>
    %73 = arith.mulf %46, %72 : vector<4x16x128xf32>
    %74 = vector.broadcast %71 : vector<1x1x128xf32> to vector<4x16x128xf32>
    %75 = arith.addf %73, %74 : vector<4x16x128xf32>
    %cst_32 = arith.constant 0.000000e+00 : f32
    %76 = vector.broadcast %cst_32 : f32 to vector<4x16x128xf32>
    %77 = arith.maximumf %75, %76 : vector<4x16x128xf32>
    %78 = vector.shape_cast %77 : vector<4x16x128xf32> to vector<64x128xf32>
    %cst_33 = arith.constant dense<0xFF800000> : vector<4x128xf32>
    %79 = vector.multi_reduction <maximumf>, %77, %cst_33 [1] : vector<4x16x128xf32> to vector<4x128xf32>
    %c1_34 = arith.constant 1 : index
    %c0_35 = arith.constant 0 : index
    %c0_36 = arith.constant 0 : index
    %80 = vector.load %arg2[%c1_34, %c0_35, %c0_36] : memref<2x128x128xf32, #tpu.memory_space<vmem>>, vector<1x128x128xf32>
    %81 = vector.shape_cast %80 : vector<1x128x128xf32> to vector<128x128xf32>
    %c1_37 = arith.constant 1 : index
    %c0_38 = arith.constant 0 : index
    %c0_39 = arith.constant 0 : index
    %82 = vector.load %arg3[%c1_37, %c0_38, %c0_39] : memref<2x128x128xf32, #tpu.memory_space<vmem>>, vector<1x128x128xf32>
    %83 = vector.shape_cast %82 : vector<1x128x128xf32> to vector<128x128xf32>
    %cst_40 = arith.constant dense<0.000000e+00> : vector<64x128xf32>
    %84 = tpu.matmul %78, %81, %cst_40 {dimension_numbers = #tpu.dot_dimension_numbers<[1], [0], [0], [1], [0, 0, 1, 1], [], []>} : vector<64x128xf32>, vector<128x128xf32>, vector<64x128xf32> -> vector<64x128xf32>
    %cst_41 = arith.constant dense<0.000000e+00> : vector<4x128xf32>
    %85 = tpu.matmul %79, %83, %cst_41 {dimension_numbers = #tpu.dot_dimension_numbers<[1], [0], [0], [1], [0, 0, 1, 1], [], []>} : vector<4x128xf32>, vector<128x128xf32>, vector<4x128xf32> -> vector<4x128xf32>
    %86 = vector.shape_cast %84 : vector<64x128xf32> to vector<4x16x128xf32>
    %87 = vector.shape_cast %85 : vector<4x128xf32> to vector<4x1x128xf32>
    %88 = vector.broadcast %87 : vector<4x1x128xf32> to vector<4x16x128xf32>
    %89 = arith.addf %86, %88 : vector<4x16x128xf32>
    %c2 = arith.constant 2 : index
    %c0_42 = arith.constant 0 : index
    %90 = vector.load %arg4[%c2, %c0_42] : memref<3x128xf32, #tpu.memory_space<vmem>>, vector<1x128xf32>
    %91 = vector.shape_cast %90 : vector<1x128xf32> to vector<128xf32>
    %c2_43 = arith.constant 2 : index
    %c0_44 = arith.constant 0 : index
    %92 = vector.load %arg5[%c2_43, %c0_44] : memref<3x128xf32, #tpu.memory_space<vmem>>, vector<1x128xf32>
    %93 = vector.shape_cast %92 : vector<1x128xf32> to vector<128xf32>
    %cst_45 = arith.constant dense<0.000000e+00> : vector<128xf32>
    %94 = vector.multi_reduction <add>, %89, %cst_45 [0, 1] : vector<4x16x128xf32> to vector<128xf32>
    %95 = vector.shape_cast %94 : vector<128xf32> to vector<1x1x128xf32>
    %96 = arith.mulf %89, %89 : vector<4x16x128xf32>
    %cst_46 = arith.constant dense<0.000000e+00> : vector<128xf32>
    %97 = vector.multi_reduction <add>, %96, %cst_46 [0, 1] : vector<4x16x128xf32> to vector<128xf32>
    %98 = vector.shape_cast %97 : vector<128xf32> to vector<1x1x128xf32>
    %cst_47 = arith.constant 1.562500e-02 : f32
    %99 = vector.broadcast %cst_47 : f32 to vector<1x1x128xf32>
    %100 = arith.mulf %95, %99 : vector<1x1x128xf32>
    %cst_48 = arith.constant 1.562500e-02 : f32
    %101 = vector.broadcast %cst_48 : f32 to vector<1x1x128xf32>
    %102 = arith.mulf %98, %101 : vector<1x1x128xf32>
    %103 = arith.mulf %100, %100 : vector<1x1x128xf32>
    %104 = arith.subf %102, %103 : vector<1x1x128xf32>
    %cst_49 = arith.constant 0.000000e+00 : f32
    %105 = vector.broadcast %cst_49 : f32 to vector<1x1x128xf32>
    %106 = arith.maximumf %104, %105 : vector<1x1x128xf32>
    %107 = vector.shape_cast %91 : vector<128xf32> to vector<1x1x128xf32>
    %cst_50 = arith.constant 9.99999974E-6 : f32
    %108 = vector.broadcast %cst_50 : f32 to vector<1x1x128xf32>
    %109 = arith.addf %106, %108 : vector<1x1x128xf32>
    %110 = math.rsqrt %109 : vector<1x1x128xf32>
    %111 = arith.mulf %107, %110 : vector<1x1x128xf32>
    %112 = vector.shape_cast %93 : vector<128xf32> to vector<1x1x128xf32>
    %113 = arith.mulf %100, %111 : vector<1x1x128xf32>
    %114 = arith.subf %112, %113 : vector<1x1x128xf32>
    %115 = vector.broadcast %111 : vector<1x1x128xf32> to vector<4x16x128xf32>
    %116 = arith.mulf %89, %115 : vector<4x16x128xf32>
    %117 = vector.broadcast %114 : vector<1x1x128xf32> to vector<4x16x128xf32>
    %118 = arith.addf %116, %117 : vector<4x16x128xf32>
    %cst_51 = arith.constant 0.000000e+00 : f32
    %119 = vector.broadcast %cst_51 : f32 to vector<4x16x128xf32>
    %120 = arith.maximumf %118, %119 : vector<4x16x128xf32>
    %cst_52 = arith.constant dense<0xFF800000> : vector<4x128xf32>
    %121 = vector.multi_reduction <maximumf>, %120, %cst_52 [1] : vector<4x16x128xf32> to vector<4x128xf32>
    %122 = tpu.concatenate %121, %121 in 1 : vector<4x128xf32>, vector<4x128xf32> -> vector<4x256xf32>
    %c0_53 = arith.constant 0 : index
    %c0_54 = arith.constant 0 : index
    %123 = vector.load %arg6[%c0_53, %c0_54] : memref<4x256xf32, #tpu.memory_space<vmem>>, vector<4x256xf32>
    tpu.vector_store %arg6[%c0_53, %c0_54], %122 {strides = array<i32>} : memref<4x256xf32, #tpu.memory_space<vmem>>, vector<4x256xf32>,
    return
  }
}

</mosaic_0001>

<bundles_post_ra>
// kernel: _lambda_.1
= control target key start
LH: loop header
LB: loop body
LE: loop exit
PB: predicated region body
PF: predicated region fallthrough
CT: control target
= control target key end

     0   :  { %11 = vsyncpa [#allocation3], 0  ;;  %s1745_s0 = inlined_call_operand.vmem [shape: f32[4,64], index: 0, kind: input, shape index: {}]   ;;  %s1746_s1 = inlined_call_operand.vmem [shape: f32[4,128], index: 1, kind: input, shape index: {}]   ;;  %s1747_s2 = inlined_call_operand.hbm [shape: f32[2,128,128], index: 2, kind: input, shape index: {}]   ;;  %s1748_s3 = inlined_call_operand.hbm [shape: f32[2,128,128], index: 3, kind: input, shape index: {}]   ;;  %s1749_s4 = inlined_call_operand.vmem [shape: f32[3,128], index: 4, kind: input, shape index: {}]   ;;  %s1750_s5 = inlined_call_operand.vmem [shape: f32[3,128], index: 5, kind: input, shape index: {}]   ;;  %s1751_s6 = inlined_call_operand.hbm [shape: f32[4,256], index: 6, kind: output, shape index: {}]  }
   0x1   :  { %12 = vsyncpa [#allocation6], 0 }
   0x2   :  { %13 = vsyncpa [#allocation4], 0  ;;  %s1576_s21 = smov [#allocation2]   ;;  %s1504_s25 = scalar_lea.hbm %s1747_s2, 4096 }
   0x3   :  { %s23_s22 = sshll.u32 %s1576_s21, 4  ;;  %p1505_p0 = scmp.ne.s32.totalorder %s1747_s2, %s1504_s25  ;;  %s24_s22 = int_to_ptr.vmem [resolvable:$true] %s23_s22 }
   0x4   :  { %p1508_p1 = scmp.lt.u32.totalorder %s1504_s25, %s1747_s2 }
   0x6   :  { %p1510_p2 = pnand %p1508_p1, %p1505_p0 }
   0x8   :  { %1513 = shalt.err (!%p1510_p2)
}
   0x9   :  { %s1514_s30 = scalar_lea.vmem %s24_s22, 4096  ;;  %p1519_p4 = scmp.lt.s32.totalorder %s24_s22, %s24_s22 }
   0xa   :  { %p1515_p3 = scmp.ne.s32.totalorder %s24_s22, %s1514_s30  ;;  %p1520_p5 = scmp.lt.s32.totalorder %s1514_s30, %s1514_s30 }
   0xc   :  { %p1521_p6 = por %p1520_p5, %p1519_p4 }
   0xe   :  { %p1522_p7 = pnand %p1521_p6, %p1515_p3 }
  0x10   :  { %1525 = shalt.err (!%p1522_p7)
}
  0x11   :  { %s1577_s7 = smov 128   ;;  %s1578_s8 = smov 8  }
  0x12   :  { %29 = dma.hbm_to_vmem [thread:$0]  %s1747_s2, 4096, %s24_s22, [#allocation3], %s1577_s7, %s1577_s7, %s1578_s8  }
  0x13   :  { %s1579_s11 = smov [#allocation5]   ;;  %s1526_s15 = scalar_lea.hbm %s1748_s3, 4096 }
  0x14   :  { %s35_s12 = sshll.u32 %s1579_s11, 4  ;;  %p1527_p8 = scmp.ne.s32.totalorder %s1748_s3, %s1526_s15  ;;  %s36_s12 = int_to_ptr.vmem [resolvable:$true] %s35_s12 }
  0x15   :  { %p1530_p9 = scmp.lt.u32.totalorder %s1526_s15, %s1748_s3 }
  0x17   :  { %p1532_p10 = pnand %p1530_p9, %p1527_p8 }
  0x19   :  { %1535 = shalt.err (!%p1532_p10)
}
  0x1a   :  { %s1536_s20 = scalar_lea.vmem %s36_s12, 4096  ;;  %p1541_p12 = scmp.lt.s32.totalorder %s36_s12, %s36_s12 }
  0x1b   :  { %p1537_p11 = scmp.ne.s32.totalorder %s36_s12, %s1536_s20  ;;  %p1542_p13 = scmp.lt.s32.totalorder %s1536_s20, %s1536_s20 }
  0x1d   :  { %p1543_p0 = por %p1542_p13, %p1541_p12 }
  0x1f   :  { %p1544_p1 = pnand %p1543_p0, %p1537_p11 }
  0x21   :  { %1547 = shalt.err (!%p1544_p1)
}
  0x22   :  { %41 = dma.hbm_to_vmem [thread:$0]  %s1748_s3, 4096, %s36_s12, [#allocation6], %s1577_s7, %s1577_s7, %s1578_s8  }
  0x23   :  { %1570 = dma.done.wait [#allocation3], 4096  }
  0x24   :  { %1571 = vsyncadd [#allocation3], 4294963200 }
  0x25   :  { %1572 = dma.done.wait [#allocation6], 4096  }
  0x26   :  { %1573 = vsyncadd [#allocation6], 4294963200  ;;  %v52_v0 = vld [vmem:[%s1745_s0] sm:$0xf]  ;;  %vm111_vm0 = vcmask 1043456   ;;  %vm86_vm1 = vcmask 31744  }
  0x27   :  { %54 = vxpose.xlu0.b32.start.end [1/1] (short) (narrow) %v52_v0, 64  ;;  %v53_v1 = vld [vmem:[%s1746_s1] sm:$0xf]  ;;  %v327_v11 = vld [vmem:[#allocation2 + $0x8] sm:$0xff]  ;;  %v328_v13 = vld [vmem:[#allocation2 + $0x10] sm:$0xff]  ;;  %v1580_v28 = vmov 0.0|0.0  }
  0x28   :  { %1205 = vmatprep.subr.msk.mxu0 %vm111_vm0, %v53_v1  ;;  %v326_v10 = vld [vmem:[#allocation2] sm:$0xff]  ;;  %v329_v14 = vld [vmem:[#allocation2 + $0x18] sm:$0xff]  ;;  %v331_v17 = vld [vmem:[#allocation2 + $0x28] sm:$0xff]  ;;  %vm1581_vm2 = vmmov 0   ;;  %v1582_v59 = vmov 0.0   ;;  %vm467_vm3 = vcmask 1041409  }
  0x29   :  { %1206 = vmatpush3.msk.msra.mxu0 %vm111_vm0, %v53_v1  ;;  %v1377_v12 = vpack.c.bf16 %v327_v11, %v326_v10  ;;  %v1381_v15 = vpack.c.bf16 %v329_v14, %v328_v13  ;;  %v330_v16 = vld [vmem:[#allocation2 + $0x20] sm:$0xff]  ;;  %v332_v19 = vld [vmem:[#allocation2 + $0x30] sm:$0xff]  ;;  %v333_v20 = vld [vmem:[#allocation2 + $0x38] sm:$0xff]  ;;  %vm469_vm4 = vcmask 1042434   ;;  %vm471_vm5 = vcmask 1043459  }
  0x2a   :  { %v1385_v18 = vpack.c.bf16 %v331_v17, %v330_v16  ;;  %v1389_v21 = vpack.c.bf16 %v333_v20, %v332_v19  ;;  %v334_v22 = vld [vmem:[#allocation2 + $0x40] sm:$0xff]  ;;  %v335_v23 = vld [vmem:[#allocation2 + $0x48] sm:$0xff]  ;;  %1409 = vmatprep.subr.bf16.mxu0 %v1580_v28  ;;  %v336_v29 = vld [vmem:[#allocation2 + $0x50] sm:$0xff] }
  0x2b   :  { %1378 = vmatprep.subr.bf16.mxu1 %v1377_v12  ;;  %v1393_v24 = vpack.c.bf16 %v335_v23, %v334_v22  ;;  %v342_v25 = vld [vmem:[#allocation5] sm:$0xff]  ;;  %v343_v26 = vld [vmem:[#allocation5 + $0x8] sm:$0xff]  ;;  %v337_v30 = vld [vmem:[#allocation2 + $0x58] sm:$0xff] }
  0x2c   :  { %1380 = vmatpush3.bf16.msra.mxu1 %v1377_v12  ;;  %v1410_v27 = vpack.c.bf16 %v343_v26, %v342_v25  ;;  %v1397_v31 = vpack.c.bf16 %v337_v30, %v336_v29  ;;  %v344_v32 = vld [vmem:[#allocation5 + $0x10] sm:$0xff]  ;;  %v345_v33 = vld [vmem:[#allocation5 + $0x18] sm:$0xff]  ;;  %v338_v35 = vld [vmem:[#allocation2 + $0x60] sm:$0xff] }
  0x2d   :  { %1382 = vmatprep.subr.bf16.mxu1 %v1381_v15  ;;  %v1413_v34 = vpack.c.bf16 %v345_v33, %v344_v32  ;;  %v339_v36 = vld [vmem:[#allocation2 + $0x68] sm:$0xff]  ;;  %v346_v38 = vld [vmem:[#allocation5 + $0x20] sm:$0xff]  ;;  %v340_v41 = vld [vmem:[#allocation2 + $0x70] sm:$0xff] }
  0x2e   :  { %v1401_v37 = vpack.c.bf16 %v339_v36, %v338_v35  ;;  %v347_v39 = vld [vmem:[#allocation5 + $0x28] sm:$0xff]  ;;  %v341_v42 = vld [vmem:[#allocation2 + $0x78] sm:$0xff]  ;;  %v348_v43 = vld [vmem:[#allocation5 + $0x30] sm:$0xff] }
  0x2f   :  { %v1416_v40 = vpack.c.bf16 %v347_v39, %v346_v38  ;;  %v1405_v44 = vpack.c.bf16 %v341_v42, %v340_v41  ;;  %v349_v45 = vld [vmem:[#allocation5 + $0x38] sm:$0xff]  ;;  %v350_v47 = vld [vmem:[#allocation5 + $0x40] sm:$0xff]  ;;  %v351_v48 = vld [vmem:[#allocation5 + $0x48] sm:$0xff] }
  0x30   :  { %1384 = vmatpush3.bf16.msra.mxu1 %v1381_v15  ;;  %v1419_v46 = vpack.c.bf16 %v349_v45, %v348_v43  ;;  %v1422_v49 = vpack.c.bf16 %v351_v48, %v350_v47  ;;  %v352_v50 = vld [vmem:[#allocation5 + $0x50] sm:$0xff]  ;;  %v353_v51 = vld [vmem:[#allocation5 + $0x58] sm:$0xff]  ;;  %v354_v53 = vld [vmem:[#allocation5 + $0x60] sm:$0xff]  ;;  %v266_v45 = vlaneseq }
  0x31   :  { %1386 = vmatprep.subr.bf16.mxu1 %v1385_v18  ;;  %v1425_v52 = vpack.c.bf16 %v353_v51, %v352_v50  ;;  %v355_v54 = vld [vmem:[#allocation5 + $0x68] sm:$0xff]  ;;  %v356_v56 = vld [vmem:[#allocation5 + $0x70] sm:$0xff]  ;;  %v357_v57 = vld [vmem:[#allocation5 + $0x78] sm:$0xff] }
  0x32   :  { %v1428_v55 = vpack.c.bf16 %v355_v54, %v354_v53  ;;  %v1431_v58 = vpack.c.bf16 %v357_v57, %v356_v56  ;;  %v220_v47 = vld [vmem:[%s1749_s4] sm:$0x1] }
  0x33   :  { %v221_v51 = vld [vmem:[%s1750_s5] sm:$0x1] }
  0x34   :  { %1388 = vmatpush3.bf16.msra.mxu1 %v1385_v18 }
  0x35   :  { %1390 = vmatprep.subr.bf16.mxu1 %v1389_v21 }
  0x38   :  { %1392 = vmatpush3.bf16.msra.mxu1 %v1389_v21 }
  0x39   :  { %1394 = vmatprep.subr.bf16.mxu1 %v1393_v24 }
  0x3c   :  { %1396 = vmatpush3.bf16.msra.mxu1 %v1393_v24 }
  0x3d   :  { %1398 = vmatprep.subr.bf16.mxu1 %v1397_v31 }
  0x40   :  { %1400 = vmatpush3.bf16.msra.mxu1 %v1397_v31 }
  0x41   :  { %1402 = vmatprep.subr.bf16.mxu1 %v1401_v37 }
  0x44   :  { %1404 = vmatpush3.bf16.msra.mxu1 %v1401_v37 }
  0x45   :  { %1406 = vmatprep.subr.bf16.mxu1 %v1405_v44 }
  0x48   :  { %1408 = vmatpush3.bf16.msra.mxu1 %v1405_v44 }
  0xa7   :  { %v70_v2 = vpop.trf.xlu0 }
  0xa8   :  { %1207 = vmatprep.mubr.msk.f32.mxu0 %vm86_vm1, %v70_v2 }
  0xab   :  { %v71_v3 = vpop.trf.xlu0 }
  0xac   :  { %1208 = vmatmul.mubr.msk.f32.vlgmr.msra.gmra.mrb[0].mxu0 %vm86_vm1, %v71_v3 }
  0xad   :  { %1411 = vmatpush3.bf16.msra.mxu0 %v1410_v27 }
  0xae   :  { %1412 = vmatprep.subr.bf16.mxu0 %v1580_v28 }
  0xaf   :  { %v72_v4 = vpop.trf.xlu0 }
  0xb0   :  { %1210 = vmatprep.mubr.msk.f32.mxu0 %vm86_vm1, %v72_v4 }
  0xb1   :  { %1414 = vmatpush3.bf16.msra.mxu0 %v1413_v34 }
  0xb2   :  { %1415 = vmatprep.subr.bf16.mxu0 %v1580_v28 }
  0xb3   :  { %v73_v5 = vpop.trf.xlu0 }
  0xb4   :  { %1211 = vmatmul.mubr.msk.f32.gmra.mrb[2].mxu0 %vm86_vm1, %v73_v5 }
  0xb5   :  { %1417 = vmatpush3.bf16.msra.mxu0 %v1416_v40 }
  0xb6   :  { %1418 = vmatprep.subr.bf16.mxu0 %v1580_v28 }
  0xb7   :  { %v74_v6 = vpop.trf.xlu0 }
  0xb8   :  { %1213 = vmatprep.mubr.msk.f32.mxu0 %vm86_vm1, %v74_v6 }
  0xb9   :  { %1420 = vmatpush3.bf16.msra.mxu0 %v1419_v46  ;;  %v1669_v46 = vshrl.u32 %v266_v45, 7 }
  0xba   :  { %1421 = vmatprep.subr.bf16.mxu0 %v1580_v28 }
  0xbb   :  { %v75_v7 = vpop.trf.xlu0  ;;  %v1675_v48 = vsub.s32 0, %v1669_v46 }
  0xbc   :  { %1214 = vmatmul.mubr.msk.f32.gmra.mrb[4].mxu0 %vm86_vm1, %v75_v7 }
  0xbd   :  { %1423 = vmatpush3.bf16.msra.mxu0 %v1422_v49 }
  0xbe   :  { %1424 = vmatprep.subr.bf16.mxu0 %v1580_v28 }
  0xbf   :  { %v76_v8 = vpop.trf.xlu0 }
  0xc0   :  { %1216 = vmatprep.mubr.msk.f32.mxu0 %vm86_vm1, %v76_v8 }
  0xc1   :  { %1426 = vmatpush3.bf16.msra.mxu0 %v1425_v52 }
  0xc2   :  { %1427 = vmatprep.subr.bf16.mxu0 %v1580_v28 }
  0xc3   :  { %v77_v9 = vpop.trf.xlu0 }
  0xc4   :  { %1217 = vmatmul.mubr.msk.f32.gmra.mrb[6].mxu0 %vm86_vm1, %v77_v9 }
  0xc5   :  { %1429 = vmatpush3.bf16.msra.mxu0 %v1428_v55  ;;  %1295 = vmatprep.mubr.msk.f32.mxu0 %vm1581_vm2, %v1582_v59 }
  0xc6   :  { %1430 = vmatprep.subr.bf16.mxu0 %v1580_v28 }
  0xc9   :  { %1432 = vmatpush3.bf16.msra.mxu0 %v1431_v58 }
  0xca   :  { %1465 = vmatprep.subr.bf16.mxu0 %v1580_v28 }
 0x17f   :  { %v1209_v60 = vpop.f32.mrb[0].mxu0 }
 0x180   :  { %v236_v61 = vmul.f32 %v1209_v60, %v1209_v60  ;;  %v181_v62 = vpop.f32.mrb[1].mxu0 }
 0x181   :  { %v222_v63 = vadd.f32 %v1209_v60, %v181_v62  ;;  %v235_v0 = vmul.f32 %v181_v62, %v181_v62 }
 0x183   :  { %v243_v1 = vadd.f32 %v236_v61, %v235_v0 }
 0x187   :  { %v1212_v2 = vpop.f32.mrb[2].mxu0 }
 0x188   :  { %v191_v3 = vpop.f32.mrb[3].mxu0  ;;  %v238_v6 = vmul.f32 %v1212_v2, %v1212_v2 }
 0x189   :  { %v223_v4 = vadd.f32 %v222_v63, %v191_v3  ;;  %v237_v5 = vmul.f32 %v191_v3, %v191_v3 }
 0x18b   :  { %v244_v7 = vadd.f32 %v243_v1, %v237_v5  ;;  %v224_v8 = vadd.f32 %v1212_v2, %v223_v4 }
 0x18d   :  { %v245_v9 = vadd.f32 %v244_v7, %v238_v6 }
 0x18f   :  { %v1215_v10 = vpop.f32.mrb[4].mxu0 }
 0x190   :  { %v201_v11 = vpop.f32.mrb[5].mxu0  ;;  %v240_v14 = vmul.f32 %v1215_v10, %v1215_v10 }
 0x191   :  { %v225_v12 = vadd.f32 %v224_v8, %v201_v11  ;;  %v239_v13 = vmul.f32 %v201_v11, %v201_v11 }
 0x193   :  { %v246_v15 = vadd.f32 %v245_v9, %v239_v13  ;;  %v226_v16 = vadd.f32 %v1215_v10, %v225_v12 }
 0x195   :  { %v247_v17 = vadd.f32 %v246_v15, %v240_v14 }
 0x197   :  { %v1218_v18 = vpop.f32.mrb[6].mxu0 }
 0x198   :  { %v211_v19 = vpop.f32.mrb[7].mxu0  ;;  %v242_v22 = vmul.f32 %v1218_v18, %v1218_v18 }
 0x199   :  { %v227_v20 = vadd.f32 %v226_v16, %v211_v19  ;;  %v241_v21 = vmul.f32 %v211_v19, %v211_v19 }
 0x19b   :  { %v228_v23 = vadd.f32 %v1218_v18, %v227_v20  ;;  %v248_v24 = vadd.f32 %v247_v17, %v241_v21 }
 0x19d   :  { %v229_v25 = vrot.slane %v228_v23, 4  ;;  %v249_v26 = vadd.f32 %v248_v24, %v242_v22 }
 0x19f   :  { %v230_v27 = vadd.f32 %v229_v25, %v228_v23  ;;  %v250_v29 = vrot.slane %v249_v26, 4 }
 0x1a1   :  { %v231_v30 = vrot.slane %v230_v27, 2  ;;  %v251_v31 = vadd.f32 %v250_v29, %v249_v26 }
 0x1a3   :  { %v232_v32 = vadd.f32 %v231_v30, %v230_v27  ;;  %v252_v33 = vrot.slane %v251_v31, 2 }
 0x1a5   :  { %v233_v34 = vrot.slane %v232_v32, 1  ;;  %v253_v35 = vadd.f32 %v252_v33, %v251_v31 }
 0x1a7   :  { %v234_v36 = vadd.f32 %v233_v34, %v232_v32  ;;  %v254_v37 = vrot.slane %v253_v35, 1 }
 0x1a9   :  { %v255_v38 = vadd.f32 %v254_v37, %v253_v35  ;;  %v256_v39 = vmul.f32 0.015625, %v234_v36 }
 0x1ab   :  { %v257_v40 = vmul.f32 0.015625, %v255_v38  ;;  %v258_v41 = vmul.f32 %v256_v39, %v256_v39 }
 0x1ad   :  { %v259_v42 = vsub.f32 %v257_v40, %v258_v41 }
 0x1af   :  { %v260_v43 = vmax.f32 %v259_v42, 0.0 }
 0x1b1   :  { %v261_v44 = vadd.f32 1e-05, %v260_v43 }
 0x1b3   :  { %1498 = vrsqrt.f32 %v261_v44 }
 0x1bd   :  { %v1499_v49 = vpop.eup %1498 }
 0x1be   :  { %v263_v50 = vmul.f32 %v1499_v49, %v220_v47 }
 0x1c0   :  { %v264_v52 = vmul.f32 %v263_v50, %v256_v39  ;;  %v269_v53 = vrot.slane %v263_v50, %v1675_v48 }
 0x1c2   :  { %v265_v54 = vsub.f32 %v221_v51, %v264_v52  ;;  %v276_v55 = vmul.f32 %v269_v53, %v211_v19  ;;  %v270_v56 = vmul.f32 %v269_v53, %v181_v62  ;;  %v271_v57 = vmul.f32 %v1209_v60, %v269_v53  ;;  %v704_v51 = vld [vmem:[#allocation2 + $0x80] sm:$0xff]  ;;  %v705_v52 = vld [vmem:[#allocation2 + $0x88] sm:$0xff] }
 0x1c3   :  { %v272_v58 = vmul.f32 %v269_v53, %v191_v3  ;;  %v273_v61 = vmul.f32 %v1212_v2, %v269_v53  ;;  %v274_v63 = vmul.f32 %v269_v53, %v201_v11  ;;  %v275_v0 = vmul.f32 %v1215_v10, %v269_v53 }
 0x1c4   :  { %v281_v1 = vrot.slane %v265_v54, %v1675_v48  ;;  %v277_v4 = vmul.f32 %v1218_v18, %v269_v53  ;;  %v1433_v53 = vpack.c.bf16 %v705_v52, %v704_v51  ;;  %v706_v54 = vld [vmem:[#allocation2 + $0x90] sm:$0xff] }
 0x1c6   :  { %v282_v5 = vadd.f32 %v281_v1, %v270_v56  ;;  %v283_v6 = vadd.f32 %v281_v1, %v271_v57  ;;  %v284_v7 = vadd.f32 %v281_v1, %v272_v58  ;;  %v285_v8 = vadd.f32 %v281_v1, %v273_v61  ;;  %1434 = vmatprep.subr.bf16.mxu1 %v1433_v53  ;;  %v708_v57 = vld [vmem:[#allocation2 + $0xa0] sm:$0xff]  ;;  %v709_v58 = vld [vmem:[#allocation2 + $0xa8] sm:$0xff] }
 0x1c7   :  { %v286_v9 = vadd.f32 %v281_v1, %v274_v63  ;;  %v287_v12 = vadd.f32 %v281_v1, %v275_v0  ;;  %v288_v13 = vadd.f32 %v281_v1, %v276_v55  ;;  %v289_v14 = vadd.f32 %v281_v1, %v277_v4  ;;  %v707_v55 = vld [vmem:[#allocation2 + $0x98] sm:$0xff]  ;;  %v710_v63 = vld [vmem:[#allocation2 + $0xb0] sm:$0xff]  ;;  %v713_v4 = vld [vmem:[#allocation2 + $0xc8] sm:$0xff] }
 0x1c8   :  { %v290_v15 = vmax.f32 %v282_v5, 0.0  ;;  %v291_v16 = vmax.f32 %v283_v6, 0.0  ;;  %v292_v17 = vmax.f32 %v284_v7, 0.0  ;;  %v293_v62 = vmax.f32 %v285_v8, 0.0  ;;  %v711_v0 = vld [vmem:[#allocation2 + $0xb8] sm:$0xff]  ;;  %v721_v6 = vld [vmem:[#allocation5 + $0x80] sm:$0xff] }
 0x1c9   :  { %v294_v60 = vmax.f32 %v286_v9, 0.0  ;;  %v295_v3 = vmax.f32 %v287_v12, 0.0  ;;  %v296_v2 = vmax.f32 %v288_v13, 0.0  ;;  %v297_v11 = vmax.f32 %v289_v14, 0.0  ;;  %v722_v7 = vld [vmem:[#allocation5 + $0x88] sm:$0xff]  ;;  %v714_v9 = vld [vmem:[#allocation2 + $0xd0] sm:$0xff] }
 0x1ca   :  { %v298_v10 = vmax.f32 %v290_v15, %v291_v16  ;;  %1251 = vmatprep.mubr.f32.mxu1 %v290_v15  ;;  %v305_v19 = vmax.f32 %v292_v17, %v293_v62  ;;  %v1437_v56 = vpack.c.bf16 %v707_v55, %v706_v54  ;;  %v1441_v61 = vpack.c.bf16 %v709_v58, %v708_v57  ;;  %v715_v12 = vld [vmem:[#allocation2 + $0xd8] sm:$0xff]  ;;  %v723_v14 = vld [vmem:[#allocation5 + $0x90] sm:$0xff] }
 0x1cb   :  { %1252 = vmatmul.mubr.f32.vlgmr.msra.gmra.mrb[0].mxu1 %v291_v16  ;;  %v312_v18 = vmax.f32 %v294_v60, %v295_v3  ;;  %v319_v20 = vmax.f32 %v296_v2, %v297_v11  ;;  %v1445_v1 = vpack.c.bf16 %v711_v0, %v710_v63  ;;  %v1466_v8 = vpack.c.bf16 %v722_v7, %v721_v6  ;;  %v724_v15 = vld [vmem:[#allocation5 + $0x98] sm:$0xff] }
 0x1cc   :  { %v299_v21 = vrot.slane %v298_v10, 4  ;;  %1254 = vmatprep.mubr.f32.mxu1 %v292_v17  ;;  %v306_v22 = vrot.slane %v305_v19, 4  ;;  %1436 = vmatpush3.bf16.msra.mxu1 %v1433_v53  ;;  %v1453_v13 = vpack.c.bf16 %v715_v12, %v714_v9  ;;  %v1469_v16 = vpack.c.bf16 %v724_v15, %v723_v14  ;;  %v716_v17 = vld [vmem:[#allocation2 + $0xe0] sm:$0xff] }
 0x1cd   :  { %v313_v23 = vrot.slane %v312_v18, 4  ;;  %v320_v24 = vrot.slane %v319_v20, 4  ;;  %1438 = vmatprep.subr.bf16.mxu1 %v1437_v56 }
 0x1ce   :  { %v300_v25 = vmax.f32 %v298_v10, %v299_v21  ;;  %v307_v26 = vmax.f32 %v305_v19, %v306_v22  ;;  %v718_v10 = vld [vmem:[#allocation2 + $0xf0] sm:$0xff]  ;;  %v719_v19 = vld [vmem:[#allocation2 + $0xf8] sm:$0xff] }
 0x1cf   :  { %1255 = vmatmul.mubr.f32.gmra.mrb[2].mxu1 %v293_v62  ;;  %v314_v27 = vmax.f32 %v312_v18, %v313_v23  ;;  %v321_v29 = vmax.f32 %v319_v20, %v320_v24  ;;  %v717_v62 = vld [vmem:[#allocation2 + $0xe8] sm:$0xff]  ;;  %v727_v18 = vld [vmem:[#allocation5 + $0xb0] sm:$0xff]  ;;  %v1461_v20 = vpack.c.bf16 %v719_v19, %v718_v10  ;;  %v728_v21 = vld [vmem:[#allocation5 + $0xb8] sm:$0xff] }
 0x1d0   :  { %v301_v30 = vrot.slane %v300_v25, 2  ;;  %v308_v31 = vrot.slane %v307_v26, 2  ;;  %1257 = vmatprep.mubr.f32.mxu1 %v294_v60  ;;  %1440 = vmatpush3.bf16.msra.mxu1 %v1437_v56  ;;  %v1457_v60 = vpack.c.bf16 %v717_v62, %v716_v17  ;;  %v1475_v22 = vpack.c.bf16 %v728_v21, %v727_v18  ;;  %v729_v23 = vld [vmem:[#allocation5 + $0xc0] sm:$0xff]  ;;  %v730_v24 = vld [vmem:[#allocation5 + $0xc8] sm:$0xff] }
 0x1d1   :  { %v315_v32 = vrot.slane %v314_v27, 2  ;;  %v322_v33 = vrot.slane %v321_v29, 2  ;;  %1442 = vmatprep.subr.bf16.mxu1 %v1441_v61 }
 0x1d2   :  { %v302_v34 = vmax.f32 %v300_v25, %v301_v30  ;;  %v309_v35 = vmax.f32 %v307_v26, %v308_v31  ;;  %v1478_v25 = vpack.c.bf16 %v730_v24, %v729_v23  ;;  %v731_v26 = vld [vmem:[#allocation5 + $0xd0] sm:$0xff]  ;;  %v733_v30 = vld [vmem:[#allocation5 + $0xe0] sm:$0xff]  ;;  %v734_v31 = vld [vmem:[#allocation5 + $0xe8] sm:$0xff] }
 0x1d3   :  { %v316_v36 = vmax.f32 %v314_v27, %v315_v32  ;;  %1258 = vmatmul.mubr.f32.gmra.mrb[4].mxu1 %v295_v3  ;;  %v323_v37 = vmax.f32 %v321_v29, %v322_v33  ;;  %v725_v3 = vld [vmem:[#allocation5 + $0xa0] sm:$0xff]  ;;  %v732_v27 = vld [vmem:[#allocation5 + $0xd8] sm:$0xff]  ;;  %v1484_v32 = vpack.c.bf16 %v734_v31, %v733_v30  ;;  %v735_v33 = vld [vmem:[#allocation5 + $0xf0] sm:$0xff] }
 0x1d4   :  { %v303_v38 = vrot.slane %v302_v34, 1  ;;  %v310_v39 = vrot.slane %v309_v35, 1  ;;  %1260 = vmatprep.mubr.f32.mxu1 %v296_v2  ;;  %1444 = vmatpush3.bf16.msra.mxu1 %v1441_v61  ;;  %v726_v2 = vld [vmem:[#allocation5 + $0xa8] sm:$0xff]  ;;  %v1481_v29 = vpack.c.bf16 %v732_v27, %v731_v26 }
 0x1d5   :  { %v317_v40 = vrot.slane %v316_v36, 1  ;;  %v324_v41 = vrot.slane %v323_v37, 1  ;;  %1446 = vmatprep.subr.bf16.mxu1 %v1445_v1 }
 0x1d6   :  { %v304_v42 = vmax.f32 %v302_v34, %v303_v38  ;;  %v311_v43 = vmax.f32 %v309_v35, %v310_v39  ;;  %v736_v34 = vld [vmem:[#allocation5 + $0xf8] sm:$0xff] }
 0x1d7   :  { %v318_v44 = vmax.f32 %v316_v36, %v317_v40  ;;  %1261 = vmatmul.mubr.f32.gmra.mrb[6].mxu1 %v297_v11  ;;  %v325_v45 = vmax.f32 %v323_v37, %v324_v41  ;;  %v1472_v11 = vpack.c.bf16 %v726_v2, %v725_v3  ;;  %v1487_v35 = vpack.c.bf16 %v736_v34, %v735_v33 }
 0x1d8   :  { %v468_v47 = vsel %vm467_vm3, %v311_v43, %v304_v42  ;;  %1448 = vmatpush3.bf16.msra.mxu1 %v1445_v1  ;;  %v1583_v40 = vmov 1966171168  }
 0x1d9   :  { %v470_v49 = vsel %vm469_vm4, %v318_v44, %v468_v47  ;;  %v546_v41 = vunpack.c.l.s4 %v1583_v40 }
 0x1da   :  { %v472_v50 = vsel %vm471_vm5, %v325_v45, %v470_v49 }
 0x1db   :  { %1296 = vmatmul.mubr.f32.vlgmr.msra.gmra.mrb[8].mxu0 %v472_v50  ;;  %v547_v44 = vunpack.c.0.s8 %v546_v41 }
 0x1dc   :  { %1374 = vmatprep.mubr.msk.f32.mxu0 %vm1581_vm2, %v1582_v59  ;;  %v712_v59 = vld [vmem:[#allocation2 + $0xc0] sm:$0xff]  ;;  %1467 = vmatpush3.bf16.msra.mxu0 %v1466_v8 }
 0x1dd   :  { %v1449_v5 = vpack.c.bf16 %v713_v4, %v712_v59  ;;  %1468 = vmatprep.subr.bf16.mxu0 %v1580_v28  ;;  %v1695_v49 = vsub.s32 %v547_v44, %v1669_v46 }
 0x1df   :  { %1450 = vmatprep.subr.bf16.mxu1 %v1449_v5 }
 0x1e0   :  { %1452 = vmatpush3.bf16.msra.mxu1 %v1449_v5  ;;  %1470 = vmatpush3.bf16.msra.mxu0 %v1469_v16 }
 0x1e1   :  { %1454 = vmatprep.subr.bf16.mxu1 %v1453_v13  ;;  %1471 = vmatprep.subr.bf16.mxu0 %v1580_v28 }
 0x1e4   :  { %1456 = vmatpush3.bf16.msra.mxu1 %v1453_v13  ;;  %1473 = vmatpush3.bf16.msra.mxu0 %v1472_v11 }
 0x1e5   :  { %1458 = vmatprep.subr.bf16.mxu1 %v1457_v60  ;;  %1474 = vmatprep.subr.bf16.mxu0 %v1580_v28 }
 0x1e8   :  { %1460 = vmatpush3.bf16.msra.mxu1 %v1457_v60  ;;  %1476 = vmatpush3.bf16.msra.mxu0 %v1475_v22 }
 0x1e9   :  { %1462 = vmatprep.subr.bf16.mxu1 %v1461_v20  ;;  %1477 = vmatprep.subr.bf16.mxu0 %v1580_v28 }
 0x1ec   :  { %1464 = vmatpush3.bf16.msra.mxu1 %v1461_v20  ;;  %1479 = vmatpush3.bf16.msra.mxu0 %v1478_v25 }
 0x1ed   :  { %1480 = vmatprep.subr.bf16.mxu0 %v1580_v28 }
 0x1f0   :  { %1482 = vmatpush3.bf16.msra.mxu0 %v1481_v29 }
 0x1f1   :  { %1483 = vmatprep.subr.bf16.mxu0 %v1580_v28 }
 0x1f4   :  { %1485 = vmatpush3.bf16.msra.mxu0 %v1484_v32 }
 0x1f5   :  { %1486 = vmatprep.subr.bf16.mxu0 %v1580_v28 }
 0x1f8   :  { %1488 = vmatpush3.bf16.msra.mxu0 %v1487_v35 }
 0x29e   :  { %v1253_v36 = vpop.f32.mrb[0].mxu1 }
 0x29f   :  { %v424_v37 = vpop.f32.mrb[1].mxu1 }
 0x2a2   :  { %v1256_v38 = vpop.f32.mrb[2].mxu1 }
 0x2a3   :  { %v434_v39 = vpop.f32.mrb[3].mxu1 }
 0x2a6   :  { %v1259_v42 = vpop.f32.mrb[4].mxu1 }
 0x2a7   :  { %v444_v43 = vpop.f32.mrb[5].mxu1 }
 0x2aa   :  { %v1262_v45 = vpop.f32.mrb[6].mxu1 }
 0x2ab   :  { %v454_v47 = vpop.f32.mrb[7].mxu1 }
 0x2ae   :  { %v540_v50 = vpop.f32.mrb[8].mxu0 }
 0x2af   :  { %v551_v28 = vrot.slane %v540_v50, %v1695_v49  ;;  %v1297_v51 = vpop.f32.mrb[9].mxu0 }
 0x2b1   :  { %v552_v52 = vcombine.high %v551_v28, %v551_v28  ;;  %v559_v53 = vrot.slane %v551_v28, %v1695_v49  ;;  %v598_v28 = vld [vmem:[%s1750_s5 + $0x1] sm:$0x1] }
 0x2b3   :  { %v566_v54 = vrot.slane %v552_v52, %v1695_v49  ;;  %v567_v55 = vcombine.high %v559_v53, %v559_v53  ;;  %v572_v56 = vrot.slane %v559_v53, %v1675_v48 }
 0x2b5   :  { %v568_v57 = vcombine.high %v566_v54, %v566_v54  ;;  %v576_v58 = vrot.slane %v566_v54, %v1675_v48  ;;  %v580_v61 = vrot.slane %v567_v55, %v1675_v48  ;;  %v589_v63 = vadd.f32 %v572_v56, %v424_v37 }
 0x2b6   :  { %v590_v46 = vadd.f32 %v1253_v36, %v572_v56 }
 0x2b7   :  { %v584_v0 = vrot.slane %v568_v57, %v1675_v48  ;;  %v591_v1 = vadd.f32 %v576_v58, %v434_v39  ;;  %v592_v59 = vadd.f32 %v1256_v38, %v576_v58  ;;  %v593_v4 = vadd.f32 %v580_v61, %v444_v43 }
 0x2b8   :  { %v594_v5 = vadd.f32 %v1259_v42, %v580_v61  ;;  %v599_v6 = vadd.f32 %v590_v46, %v589_v63  ;;  %v612_v7 = vmul.f32 %v589_v63, %v589_v63  ;;  %v613_v8 = vmul.f32 %v590_v46, %v590_v46 }
 0x2b9   :  { %v595_v9 = vadd.f32 %v584_v0, %v454_v47  ;;  %v596_v12 = vadd.f32 %v1262_v45, %v584_v0  ;;  %v614_v13 = vmul.f32 %v591_v1, %v591_v1  ;;  %v615_v17 = vmul.f32 %v592_v59, %v592_v59  ;;  %v597_v45 = vld [vmem:[%s1749_s4 + $0x1] sm:$0x1] }
 0x2ba   :  { %v600_v14 = vadd.f32 %v599_v6, %v591_v1  ;;  %v620_v15 = vadd.f32 %v613_v8, %v612_v7  ;;  %v616_v3 = vmul.f32 %v593_v4, %v593_v4  ;;  %v617_v10 = vmul.f32 %v594_v5, %v594_v5 }
 0x2bb   :  { %v618_v20 = vmul.f32 %v595_v9, %v595_v9  ;;  %v619_v23 = vmul.f32 %v596_v12, %v596_v12 }
 0x2bc   :  { %v601_v16 = vadd.f32 %v600_v14, %v592_v59  ;;  %v621_v62 = vadd.f32 %v620_v15, %v614_v13 }
 0x2be   :  { %v602_v60 = vadd.f32 %v601_v16, %v593_v4  ;;  %v622_v2 = vadd.f32 %v621_v62, %v615_v17 }
 0x2c0   :  { %v603_v11 = vadd.f32 %v602_v60, %v594_v5  ;;  %v623_v19 = vadd.f32 %v622_v2, %v616_v3 }
 0x2c2   :  { %v604_v18 = vadd.f32 %v603_v11, %v595_v9  ;;  %v624_v21 = vadd.f32 %v623_v19, %v617_v10 }
 0x2c4   :  { %v605_v22 = vadd.f32 %v604_v18, %v596_v12  ;;  %v625_v24 = vadd.f32 %v624_v21, %v618_v20 }
 0x2c6   :  { %v606_v25 = vrot.slane %v605_v22, 4  ;;  %v626_v26 = vadd.f32 %v625_v24, %v619_v23 }
 0x2c8   :  { %v607_v27 = vadd.f32 %v606_v25, %v605_v22  ;;  %v627_v29 = vrot.slane %v626_v26, 4 }
 0x2ca   :  { %v608_v30 = vrot.slane %v607_v27, 2  ;;  %v628_v31 = vadd.f32 %v627_v29, %v626_v26 }
 0x2cc   :  { %v609_v32 = vadd.f32 %v608_v30, %v607_v27  ;;  %v629_v33 = vrot.slane %v628_v31, 2 }
 0x2ce   :  { %v610_v34 = vrot.slane %v609_v32, 1  ;;  %v630_v35 = vadd.f32 %v629_v33, %v628_v31 }
 0x2d0   :  { %v611_v36 = vadd.f32 %v610_v34, %v609_v32  ;;  %v631_v37 = vrot.slane %v630_v35, 1 }
 0x2d2   :  { %v632_v38 = vadd.f32 %v631_v37, %v630_v35  ;;  %v633_v39 = vmul.f32 0.015625, %v611_v36 }
 0x2d4   :  { %v634_v40 = vmul.f32 0.015625, %v632_v38  ;;  %v635_v41 = vmul.f32 %v633_v39, %v633_v39 }
 0x2d6   :  { %v636_v42 = vsub.f32 %v634_v40, %v635_v41 }
 0x2d8   :  { %v637_v43 = vmax.f32 %v636_v42, 0.0 }
 0x2da   :  { %v638_v44 = vadd.f32 1e-05, %v637_v43 }
 0x2dc   :  { %1500 = vrsqrt.f32 %v638_v44 }
 0x2e6   :  { %v1501_v47 = vpop.eup %1500 }
 0x2e7   :  { %v640_v50 = vmul.f32 %v1501_v47, %v597_v45 }
 0x2e9   :  { %v641_v51 = vmul.f32 %v640_v50, %v633_v39  ;;  %v646_v52 = vrot.slane %v640_v50, %v1675_v48 }
 0x2eb   :  { %v642_v53 = vsub.f32 %v598_v28, %v641_v51  ;;  %v647_v54 = vmul.f32 %v646_v52, %v589_v63  ;;  %v648_v55 = vmul.f32 %v646_v52, %v590_v46  ;;  %v649_v56 = vmul.f32 %v646_v52, %v591_v1 }
 0x2ec   :  { %v650_v57 = vmul.f32 %v646_v52, %v592_v59  ;;  %v651_v58 = vmul.f32 %v646_v52, %v593_v4  ;;  %v652_v61 = vmul.f32 %v646_v52, %v594_v5  ;;  %v653_v0 = vmul.f32 %v646_v52, %v595_v9 }
 0x2ed   :  { %v658_v6 = vrot.slane %v642_v53, %v1675_v48  ;;  %v654_v7 = vmul.f32 %v646_v52, %v596_v12 }
 0x2ef   :  { %v659_v8 = vadd.f32 %v658_v6, %v647_v54  ;;  %v660_v13 = vadd.f32 %v658_v6, %v648_v55  ;;  %v661_v14 = vadd.f32 %v658_v6, %v649_v56  ;;  %v662_v15 = vadd.f32 %v658_v6, %v650_v57 }
 0x2f0   :  { %v663_v16 = vadd.f32 %v658_v6, %v651_v58  ;;  %v664_v17 = vadd.f32 %v658_v6, %v652_v61  ;;  %v665_v62 = vadd.f32 %v658_v6, %v653_v0  ;;  %v666_v60 = vadd.f32 %v658_v6, %v654_v7 }
 0x2f1   :  { %v667_v3 = vmax.f32 %v659_v8, 0.0  ;;  %v668_v2 = vmax.f32 %v660_v13, 0.0  ;;  %v669_v63 = vmax.f32 %v661_v14, 0.0  ;;  %v670_v46 = vmax.f32 %v662_v15, 0.0 }
 0x2f2   :  { %v671_v1 = vmax.f32 %v663_v16, 0.0  ;;  %v672_v59 = vmax.f32 %v664_v17, 0.0  ;;  %v673_v4 = vmax.f32 %v665_v62, 0.0  ;;  %v674_v5 = vmax.f32 %v666_v60, 0.0 }
 0x2f3   :  { %v675_v9 = vmax.f32 %v667_v3, %v668_v2  ;;  %1330 = vmatprep.mubr.f32.mxu1 %v667_v3  ;;  %v682_v11 = vmax.f32 %v669_v63, %v670_v46 }
 0x2f4   :  { %1331 = vmatmul.mubr.f32.vlgmr.msra.gmra.mrb[8].mxu1 %v668_v2  ;;  %v689_v12 = vmax.f32 %v671_v1, %v672_v59  ;;  %v696_v10 = vmax.f32 %v673_v4, %v674_v5 }
 0x2f5   :  { %v676_v19 = vrot.slane %v675_v9, 4  ;;  %1333 = vmatprep.mubr.f32.mxu1 %v669_v63  ;;  %v683_v18 = vrot.slane %v682_v11, 4 }
 0x2f6   :  { %v690_v20 = vrot.slane %v689_v12, 4  ;;  %v697_v21 = vrot.slane %v696_v10, 4 }
 0x2f7   :  { %v677_v22 = vmax.f32 %v675_v9, %v676_v19  ;;  %v684_v23 = vmax.f32 %v682_v11, %v683_v18 }
 0x2f8   :  { %1334 = vmatmul.mubr.f32.gmra.mrb[10].mxu1 %v670_v46  ;;  %v691_v24 = vmax.f32 %v689_v12, %v690_v20  ;;  %v698_v25 = vmax.f32 %v696_v10, %v697_v21 }
 0x2f9   :  { %v678_v26 = vrot.slane %v677_v22, 2  ;;  %v685_v27 = vrot.slane %v684_v23, 2  ;;  %1336 = vmatprep.mubr.f32.mxu1 %v671_v1 }
 0x2fa   :  { %v692_v29 = vrot.slane %v691_v24, 2  ;;  %v699_v30 = vrot.slane %v698_v25, 2 }
 0x2fb   :  { %v679_v31 = vmax.f32 %v677_v22, %v678_v26  ;;  %v686_v32 = vmax.f32 %v684_v23, %v685_v27 }
 0x2fc   :  { %v693_v33 = vmax.f32 %v691_v24, %v692_v29  ;;  %1337 = vmatmul.mubr.f32.gmra.mrb[12].mxu1 %v672_v59  ;;  %v700_v34 = vmax.f32 %v698_v25, %v699_v30 }
 0x2fd   :  { %v680_v35 = vrot.slane %v679_v31, 1  ;;  %v687_v36 = vrot.slane %v686_v32, 1  ;;  %1339 = vmatprep.mubr.f32.mxu1 %v673_v4 }
 0x2fe   :  { %v694_v37 = vrot.slane %v693_v33, 1  ;;  %v701_v38 = vrot.slane %v700_v34, 1 }
 0x2ff   :  { %v681_v39 = vmax.f32 %v679_v31, %v680_v35  ;;  %v688_v40 = vmax.f32 %v686_v32, %v687_v36 }
 0x300   :  { %1340 = vmatmul.mubr.f32.gmra.mrb[14].mxu1 %v674_v5  ;;  %v695_v41 = vmax.f32 %v693_v33, %v694_v37  ;;  %v702_v42 = vmax.f32 %v700_v34, %v701_v38 }
 0x301   :  { %v846_v43 = vsel %vm467_vm3, %v688_v40, %v681_v39 }
 0x302   :  { %v847_v44 = vsel %vm469_vm4, %v695_v41, %v846_v43 }
 0x303   :  { %v848_v45 = vsel %vm471_vm5, %v702_v42, %v847_v44 }
 0x304   :  { %1375 = vmatmul.mubr.f32.vlgmr.msra.gmra.mrb[10].mxu0 %v848_v45 }
 0x3c7   :  { %v1332_v47 = vpop.f32.mrb[8].mxu1 }
 0x3c8   :  { %v803_v50 = vpop.f32.mrb[9].mxu1 }
 0x3cb   :  { %v1335_v28 = vpop.f32.mrb[10].mxu1 }
 0x3cc   :  { %v813_v51 = vpop.f32.mrb[11].mxu1 }
 0x3cf   :  { %v1338_v52 = vpop.f32.mrb[12].mxu1 }
 0x3d0   :  { %v823_v53 = vpop.f32.mrb[13].mxu1 }
 0x3d3   :  { %v1341_v54 = vpop.f32.mrb[14].mxu1 }
 0x3d4   :  { %v833_v55 = vpop.f32.mrb[15].mxu1 }
 0x3d7   :  { %v916_v56 = vpop.f32.mrb[10].mxu0 }
 0x3d8   :  { %v927_v57 = vrot.slane %v916_v56, %v1695_v49  ;;  %v1376_v58 = vpop.f32.mrb[11].mxu0  ;;  %v974_v56 = vld [vmem:[%s1750_s5 + $0x2] sm:$0x1] }
 0x3da   :  { %v928_v61 = vcombine.high %v927_v57, %v927_v57  ;;  %v935_v0 = vrot.slane %v927_v57, %v1695_v49 }
 0x3dc   :  { %v942_v6 = vrot.slane %v928_v61, %v1695_v49  ;;  %v943_v7 = vcombine.high %v935_v0, %v935_v0  ;;  %v948_v8 = vrot.slane %v935_v0, %v1675_v48 }
 0x3de   :  { %v944_v13 = vcombine.high %v942_v6, %v942_v6  ;;  %v952_v14 = vrot.slane %v942_v6, %v1675_v48  ;;  %v956_v15 = vrot.slane %v943_v7, %v1675_v48  ;;  %v965_v16 = vadd.f32 %v948_v8, %v803_v50 }
 0x3df   :  { %v966_v17 = vadd.f32 %v1332_v47, %v948_v8 }
 0x3e0   :  { %v960_v62 = vrot.slane %v944_v13, %v1675_v48  ;;  %v967_v60 = vadd.f32 %v952_v14, %v813_v51  ;;  %v968_v3 = vadd.f32 %v1335_v28, %v952_v14  ;;  %v969_v2 = vadd.f32 %v956_v15, %v823_v53  ;;  %v973_v53 = vld [vmem:[%s1749_s4 + $0x2] sm:$0x1]  ;;  %s1584_s4 = smov [#allocation7]  }
 0x3e1   :  { %v970_v63 = vadd.f32 %v1338_v52, %v956_v15  ;;  %v975_v46 = vadd.f32 %v966_v17, %v965_v16  ;;  %v988_v1 = vmul.f32 %v965_v16, %v965_v16  ;;  %v989_v59 = vmul.f32 %v966_v17, %v966_v17  ;;  %s1095_s5 = sshll.u32 %s1584_s4, 4  ;;  %s1096_s5 = int_to_ptr.vmem [resolvable:$true] %s1095_s5 }
 0x3e2   :  { %v971_v49 = vadd.f32 %v960_v62, %v833_v55  ;;  %v972_v4 = vadd.f32 %v1341_v54, %v960_v62  ;;  %v990_v5 = vmul.f32 %v967_v60, %v967_v60  ;;  %v991_v10 = vmul.f32 %v968_v3, %v968_v3  ;;  %s1548_s11 = scalar_lea.vmem %s1096_s5, 128  ;;  %p1553_p3 = scmp.lt.s32.totalorder %s1096_s5, %s1096_s5 }
 0x3e3   :  { %v976_v9 = vadd.f32 %v975_v46, %v967_v60  ;;  %v996_v11 = vadd.f32 %v989_v59, %v988_v1  ;;  %v992_v20 = vmul.f32 %v969_v2, %v969_v2  ;;  %v993_v23 = vmul.f32 %v970_v63, %v970_v63  ;;  %p1549_p2 = scmp.ne.s32.totalorder %s1096_s5, %s1548_s11  ;;  %p1554_p4 = scmp.lt.s32.totalorder %s1548_s11, %s1548_s11 }
 0x3e4   :  { %v994_v26 = vmul.f32 %v971_v49, %v971_v49  ;;  %v995_v30 = vmul.f32 %v972_v4, %v972_v4 }
 0x3e5   :  { %v977_v12 = vadd.f32 %v976_v9, %v968_v3  ;;  %v997_v19 = vadd.f32 %v996_v11, %v990_v5  ;;  %p1555_p5 = por %p1554_p4, %p1553_p3 }
 0x3e7   :  { %v978_v18 = vadd.f32 %v977_v12, %v969_v2  ;;  %v998_v21 = vadd.f32 %v997_v19, %v991_v10  ;;  %p1556_p6 = pnand %p1555_p5, %p1549_p2 }
 0x3e9   :  { %v979_v22 = vadd.f32 %v978_v18, %v970_v63  ;;  %v999_v24 = vadd.f32 %v998_v21, %v992_v20 }
 0x3eb   :  { %v980_v25 = vadd.f32 %v979_v22, %v971_v49  ;;  %v1000_v27 = vadd.f32 %v999_v24, %v993_v23 }
 0x3ed   :  { %v981_v29 = vadd.f32 %v980_v25, %v972_v4  ;;  %v1001_v31 = vadd.f32 %v1000_v27, %v994_v26 }
 0x3ef   :  { %v982_v32 = vrot.slane %v981_v29, 4  ;;  %v1002_v33 = vadd.f32 %v1001_v31, %v995_v30 }
 0x3f1   :  { %v983_v34 = vadd.f32 %v982_v32, %v981_v29  ;;  %v1003_v35 = vrot.slane %v1002_v33, 4 }
 0x3f3   :  { %v984_v36 = vrot.slane %v983_v34, 2  ;;  %v1004_v37 = vadd.f32 %v1003_v35, %v1002_v33 }
 0x3f5   :  { %v985_v38 = vadd.f32 %v984_v36, %v983_v34  ;;  %v1005_v39 = vrot.slane %v1004_v37, 2 }
 0x3f7   :  { %v986_v40 = vrot.slane %v985_v38, 1  ;;  %v1006_v41 = vadd.f32 %v1005_v39, %v1004_v37 }
 0x3f9   :  { %v987_v42 = vadd.f32 %v986_v40, %v985_v38  ;;  %v1007_v43 = vrot.slane %v1006_v41, 1 }
 0x3fb   :  { %v1008_v44 = vadd.f32 %v1007_v43, %v1006_v41  ;;  %v1009_v45 = vmul.f32 0.015625, %v987_v42 }
 0x3fd   :  { %v1010_v47 = vmul.f32 0.015625, %v1008_v44  ;;  %v1011_v50 = vmul.f32 %v1009_v45, %v1009_v45 }
 0x3ff   :  { %v1012_v28 = vsub.f32 %v1010_v47, %v1011_v50 }
 0x401   :  { %v1013_v51 = vmax.f32 %v1012_v28, 0.0 }
 0x403   :  { %v1014_v52 = vadd.f32 1e-05, %v1013_v51 }
 0x405   :  { %1502 = vrsqrt.f32 %v1014_v52 }
 0x40f   :  { %v1503_v54 = vpop.eup %1502 }
 0x410   :  { %v1016_v55 = vmul.f32 %v1503_v54, %v973_v53 }
 0x412   :  { %v1017_v57 = vmul.f32 %v1016_v55, %v1009_v45  ;;  %v1022_v58 = vrot.slane %v1016_v55, %v1675_v48 }
 0x414   :  { %v1018_v61 = vsub.f32 %v974_v56, %v1017_v57  ;;  %v1023_v0 = vmul.f32 %v1022_v58, %v965_v16  ;;  %v1024_v6 = vmul.f32 %v1022_v58, %v966_v17  ;;  %v1025_v7 = vmul.f32 %v1022_v58, %v967_v60 }
 0x415   :  { %v1026_v8 = vmul.f32 %v1022_v58, %v968_v3  ;;  %v1027_v13 = vmul.f32 %v1022_v58, %v969_v2  ;;  %v1028_v14 = vmul.f32 %v1022_v58, %v970_v63  ;;  %v1029_v15 = vmul.f32 %v1022_v58, %v971_v49 }
 0x416   :  { %v1030_v62 = vmul.f32 %v1022_v58, %v972_v4  ;;  %v1034_v46 = vrot.slane %v1018_v61, %v1675_v48 }
 0x418   :  { %v1035_v1 = vadd.f32 %v1034_v46, %v1023_v0  ;;  %v1036_v59 = vadd.f32 %v1034_v46, %v1024_v6  ;;  %v1037_v5 = vadd.f32 %v1034_v46, %v1025_v7  ;;  %v1038_v9 = vadd.f32 %v1034_v46, %v1026_v8 }
 0x419   :  { %v1039_v11 = vadd.f32 %v1034_v46, %v1027_v13  ;;  %v1040_v12 = vadd.f32 %v1034_v46, %v1028_v14  ;;  %v1041_v10 = vadd.f32 %v1034_v46, %v1029_v15  ;;  %v1042_v19 = vadd.f32 %v1034_v46, %v1030_v62 }
 0x41a   :  { %v1043_v18 = vmax.f32 %v1035_v1, 0.0  ;;  %v1044_v20 = vmax.f32 %v1036_v59, 0.0  ;;  %v1045_v16 = vmax.f32 %v1037_v5, 0.0  ;;  %v1046_v17 = vmax.f32 %v1038_v9, 0.0 }
 0x41b   :  { %v1047_v60 = vmax.f32 %v1039_v11, 0.0  ;;  %v1048_v3 = vmax.f32 %v1040_v12, 0.0  ;;  %v1049_v2 = vmax.f32 %v1041_v10, 0.0  ;;  %v1050_v63 = vmax.f32 %v1042_v19, 0.0 }
 0x41c   :  { %v1051_v49 = vmax.f32 %v1043_v18, %v1044_v20  ;;  %v1058_v4 = vmax.f32 %v1045_v16, %v1046_v17 }
 0x41d   :  { %v1065_v21 = vmax.f32 %v1047_v60, %v1048_v3  ;;  %v1072_v48 = vmax.f32 %v1049_v2, %v1050_v63 }
 0x41e   :  { %v1052_v22 = vrot.slane %v1051_v49, 4  ;;  %v1059_v23 = vrot.slane %v1058_v4, 4 }
 0x41f   :  { %v1066_v24 = vrot.slane %v1065_v21, 4  ;;  %v1073_v25 = vrot.slane %v1072_v48, 4 }
 0x420   :  { %v1053_v26 = vmax.f32 %v1051_v49, %v1052_v22  ;;  %v1060_v27 = vmax.f32 %v1058_v4, %v1059_v23 }
 0x421   :  { %v1067_v29 = vmax.f32 %v1065_v21, %v1066_v24  ;;  %v1074_v30 = vmax.f32 %v1072_v48, %v1073_v25 }
 0x422   :  { %v1054_v31 = vrot.slane %v1053_v26, 2  ;;  %v1061_v32 = vrot.slane %v1060_v27, 2 }
 0x423   :  { %v1068_v33 = vrot.slane %v1067_v29, 2  ;;  %v1075_v34 = vrot.slane %v1074_v30, 2 }
 0x424   :  { %v1055_v35 = vmax.f32 %v1053_v26, %v1054_v31  ;;  %v1062_v36 = vmax.f32 %v1060_v27, %v1061_v32 }
 0x425   :  { %v1069_v37 = vmax.f32 %v1067_v29, %v1068_v33  ;;  %v1076_v38 = vmax.f32 %v1074_v30, %v1075_v34 }
 0x426   :  { %v1056_v39 = vrot.slane %v1055_v35, 1  ;;  %v1063_v40 = vrot.slane %v1062_v36, 1 }
 0x427   :  { %v1070_v41 = vrot.slane %v1069_v37, 1  ;;  %v1077_v42 = vrot.slane %v1076_v38, 1 }
 0x428   :  { %v1057_v43 = vmax.f32 %v1055_v35, %v1056_v39  ;;  %v1064_v44 = vmax.f32 %v1062_v36, %v1063_v40 }
 0x429   :  { %v1071_v45 = vmax.f32 %v1069_v37, %v1070_v41  ;;  %v1078_v47 = vmax.f32 %v1076_v38, %v1077_v42 }
 0x42a   :  { %v1083_v50 = vsel %vm467_vm3, %v1064_v44, %v1057_v43 }
 0x42b   :  { %v1084_v28 = vsel %vm469_vm4, %v1071_v45, %v1083_v50 }
 0x42c   :  { %v1085_v51 = vsel %vm471_vm5, %v1078_v47, %v1084_v28 }
 0x42d   :  { %v1086_v52 = vcombine.low %v1085_v51, %v1085_v51 }
 0x42f   :  { %1088 = vst [vmem:[#allocation7] sm:$0xff] %v1086_v52 }
 0x430   :  { %1559 = shalt.err (!%p1556_p6)
}
 0x431   :  { %s1560_s14 = scalar_lea.hbm %s1751_s6, 128 }
 0x432   :  { %p1561_p7 = scmp.ne.s32.totalorder %s1751_s6, %s1560_s14  ;;  %p1564_p8 = scmp.lt.u32.totalorder %s1560_s14, %s1751_s6 }
 0x434   :  { %p1566_p9 = pnand %p1564_p8, %p1561_p7 }
 0x436   :  { %1569 = shalt.err (!%p1566_p9)
}
 0x437   :  { %1098 = dma.vmem_to_hbm [thread:$0]  %s1096_s5, 128, %s1751_s6, [#allocation4]  }
 0x438   :  { %1574 = dma.done.wait [#allocation4], 128  }
 0x439   :  { %1575 = vsyncadd [#allocation4], 4294967168 }
 0x43a   :  { %1102 = vsyncpa [#allocation3], 1 }
 0x43b   :  { %1103 = vsyncpa [#allocation6], 1 }
 0x43c   :  { %1104 = vsyncpa [#allocation4], 1 }

</bundles_post_ra>
